<compile_context>
chip_gen: v6e
topology: v6e:2x2x1
jax: 0.10.0
libtpu: 0.0.40
codegen_flags: <defaults>
</compile_context>

<pallas_src>
import numpy as np
import jax
import jax.numpy as jnp
from jax.experimental import pallas as pl
from jax.experimental.pallas import tpu as pltpu


def defect_head_kernel(vec_ref, w_ref, b_ref, labels_ref, prob_ref, loss_ref):
    """Linear(H, 2) + softmax + mean cross-entropy on a (B, H) eos-vector slab.

    vec_ref:    (B, H)  bf16   eos hidden vectors
    w_ref:      (2, H)  f32    nn.Linear(H, 2).weight (original layout)
    b_ref:      (1, 2)  f32    nn.Linear(H, 2).bias
    labels_ref: (B, 1)  int32
    prob_ref:   (B, 2)  f32    softmax probabilities
    loss_ref:   (1, 1)  f32    mean cross-entropy loss
    """
    B = vec_ref.shape[0]

    v = vec_ref[...].astype(jnp.float32)          # (B, H)  promote bf16 -> f32
    w = w_ref[...]                                # (2, H)
    b = b_ref[...]                                # (1, 2)

    # --- classifier on the VPU (N=2 is far too narrow to be worth the MXU) --
    l0 = jnp.sum(v * w[0:1, :], axis=-1, keepdims=True) + b[:, 0:1]   # (B, 1)
    l1 = jnp.sum(v * w[1:2, :], axis=-1, keepdims=True) + b[:, 1:2]   # (B, 1)

    # --- numerically stable softmax / logsumexp -----------------------------
    m = jnp.maximum(l0, l1)                                            # (B, 1)
    s = jnp.exp(l0 - m) + jnp.exp(l1 - m)                              # (B, 1)
    lse = m + jnp.log(s)                                               # (B, 1)
    logits = jnp.concatenate([l0, l1], axis=-1)                        # (B, 2)
    prob_ref[...] = jnp.exp(logits - lse).astype(prob_ref.dtype)       # (B, 2)

    # --- cross-entropy loss (mean over batch), vectorized 2-class select ----
    lbl = labels_ref[...]                                              # (B, 1)
    picked = jnp.where(lbl == 0, l0, l1)                               # (B, 1)
    loss_ref[...] = (jnp.sum(lse - picked, axis=0, keepdims=True)
                     * (1.0 / B)).astype(loss_ref.dtype)               # (1, 1)


def defect_model_forward(source_ids, labels, params, *,
                         max_source_length, pad_token_id, eos_token_id,
                         model_type="codet5"):
    """Mirrors DefectModel.forward for the codet5/bart/roberta paths."""
    source_ids = source_ids.reshape(-1, max_source_length)
    B, S = source_ids.shape

    # ---- encoder stand-in (glue; the real transformer is untranslatable) ---
    # TODO(synk): real T5/BART/RoBERTa encoder not translated; deterministic
    # stand-in produces the `decoder_hidden_states[-1]` analog (B, S, H).
    emb = params["embedding"][source_ids]                      # (B, S, H)
    hidden_states = jnp.tanh(emb @ params["w_enc"])            # (B, S, H)

    # ---- eos bookkeeping (get_t5_vec / get_bart_vec / get_roberta_vec) -----
    if model_type in ("codet5", "bart"):
        eos_mask = source_ids == eos_token_id
        # Host-side validation mirroring the torch ValueError; silently
        # skipped when tracing under jit (cannot concretize a tracer).
        try:
            counts = np.unique(np.asarray(jnp.sum(eos_mask, axis=1)))
            if counts.size > 1:
                raise ValueError(
                    "All examples must have the same number of <eos> tokens.")
        except jax.errors.TracerArrayConversionError:
            pass
        pos = jax.lax.broadcasted_iota(jnp.int32, (B, S), 1)
        # last eos position per row == hidden_states[eos_mask].view(B,-1,H)[:,-1,:]
        eos_idx = jnp.max(jnp.where(eos_mask, pos, -1), axis=1).astype(jnp.int32)
    elif model_type == "roberta":
        eos_idx = jnp.zeros((B,), dtype=jnp.int32)             # [:, 0, :]
    else:
        raise ValueError(f"unknown model_type {model_type}")

    # ---- eos gather in the wrapper: only (B, H) enters the kernel ----------
    vec = hidden_states[jnp.arange(B), eos_idx]                # (B, H)
    vec = vec.astype(jnp.bfloat16)       # halve transfer bytes; f32 in-kernel

    w = params["cls_w"].astype(jnp.float32)                    # (2, H)
    b = params["cls_b"].reshape(1, 2).astype(jnp.float32)      # (1, 2)
    lbl = labels.reshape(B, 1).astype(jnp.int32)               # (B, 1)

    prob, loss = pl.pallas_call(
        defect_head_kernel,
        out_shape=(
            jax.ShapeDtypeStruct((B, 2), jnp.float32),
            jax.ShapeDtypeStruct((1, 1), jnp.float32),
        ),
        in_specs=[
            pl.BlockSpec(memory_space=pltpu.MemorySpace.VMEM),   # vec (B, H)
            pl.BlockSpec(memory_space=pltpu.MemorySpace.VMEM),   # W   (2, H)
            pl.BlockSpec(memory_space=pltpu.MemorySpace.VMEM),   # b   (1, 2)
            pl.BlockSpec(memory_space=pltpu.MemorySpace.VMEM),   # lbl (B, 1)
        ],
        out_specs=(
            pl.BlockSpec(memory_space=pltpu.MemorySpace.VMEM),
            pl.BlockSpec(memory_space=pltpu.MemorySpace.VMEM),
        ),
    )(vec, w, b, lbl)

    return loss[0, 0], prob


if __name__ == "__main__":
    # ---- small deterministic config ----------------------------------------
    B, S, H, VOCAB = 2, 16, 64, 32
    PAD_ID, EOS_ID = 0, 2

    key = jax.random.PRNGKey(0)
    k_emb, k_enc, k_w, k_b, k_tok, k_lbl = jax.random.split(key, 6)

    params = {
        "embedding": jax.random.normal(k_emb, (VOCAB, H), jnp.float32) * 0.1,
        "w_enc":     jax.random.normal(k_enc, (H, H), jnp.float32) * 0.1,
        "cls_w":     jax.random.normal(k_w, (2, H), jnp.float32) * 0.1,  # nn.Linear(H,2).weight
        "cls_b":     jax.random.normal(k_b, (2,), jnp.float32) * 0.1,    # nn.Linear(H,2).bias
    }

    # tokens in [3, VOCAB) so the only EOS/PAD tokens are the ones we place
    toks = np.array(jax.random.randint(k_tok, (B, S), 3, VOCAB),
                    dtype=np.int32)               # writable copy
    eos_pos = [10, 13]                            # exactly one <eos> per example
    for b_i, p in enumerate(eos_pos):
        toks[b_i, p] = EOS_ID
        toks[b_i, p + 1:] = PAD_ID
    source_ids = jnp.asarray(toks)
    labels = jnp.asarray(jax.random.randint(k_lbl, (B,), 0, 2), jnp.int32)

    loss, prob = defect_model_forward(
        source_ids, labels, params,
        max_source_length=S, pad_token_id=PAD_ID, eos_token_id=EOS_ID,
        model_type="codet5")
    jax.block_until_ready((loss, prob))

    # ---- pure-JAX reference check (same bf16 rounding of vec) --------------
    emb = params["embedding"][source_ids]
    hid = jnp.tanh(emb @ params["w_enc"])
    vec_ref = hid[jnp.arange(B), jnp.asarray(eos_pos)]
    vec_ref = vec_ref.astype(jnp.bfloat16).astype(jnp.float32)
    logits = vec_ref @ params["cls_w"].T + params["cls_b"]
    prob_ref = jax.nn.softmax(logits, axis=-1)
    lse = jax.scipy.special.logsumexp(logits, axis=-1)
    loss_ref = jnp.mean(lse - logits[jnp.arange(B), labels])

    np.testing.assert_allclose(np.asarray(prob), np.asarray(prob_ref),
                               rtol=1e-4, atol=1e-5)
    np.testing.assert_allclose(float(loss), float(loss_ref),
                               rtol=1e-4, atol=1e-5)
    print("KERNEL_OK")
</pallas_src>

<mosaic_0001>
module attributes {stable_mosaic.version = 11 : i64} {
  func.func @defect_head_kernel(%arg0: memref<2x64xbf16, #tpu.memory_space<vmem>>, %arg1: memref<2x64xf32, #tpu.memory_space<vmem>>, %arg2: memref<1x2xf32, #tpu.memory_space<vmem>>, %arg3: memref<2x1xi32, #tpu.memory_space<vmem>>, %arg4: memref<2x2xf32, #tpu.memory_space<vmem>>, %arg5: memref<1x1xf32, #tpu.memory_space<vmem>>) attributes {dimension_semantics = [], scalar_prefetch = 0 : i64, scratch_operands = 0 : i64, tpu.core_type = #tpu.core_type<tc>} {
    %c0 = arith.constant 0 : index
    %c0_0 = arith.constant 0 : index
    %0 = vector.load %arg0[%c0, %c0_0] : memref<2x64xbf16, #tpu.memory_space<vmem>>, vector<2x64xbf16>
    %1 = arith.extf %0 : vector<2x64xbf16> to vector<2x64xf32>
    %c0_1 = arith.constant 0 : index
    %c0_2 = arith.constant 0 : index
    %2 = vector.load %arg1[%c0_1, %c0_2] : memref<2x64xf32, #tpu.memory_space<vmem>>, vector<2x64xf32>
    %c0_3 = arith.constant 0 : index
    %c0_4 = arith.constant 0 : index
    %3 = vector.load %arg2[%c0_3, %c0_4] : memref<1x2xf32, #tpu.memory_space<vmem>>, vector<1x2xf32>
    %4 = vector.extract_strided_slice %2 {offsets = [0, 0], sizes = [1, 64], strides = [1, 1]} : vector<2x64xf32> to vector<1x64xf32>
    %5 = vector.broadcast %4 : vector<1x64xf32> to vector<2x64xf32>
    %6 = arith.mulf %1, %5 : vector<2x64xf32>
    %cst = arith.constant dense<0.000000e+00> : vector<2xf32>
    %7 = vector.multi_reduction <add>, %6, %cst [1] : vector<2x64xf32> to vector<2xf32>
    %8 = vector.shape_cast %7 : vector<2xf32> to vector<2x1xf32>
    %9 = vector.extract_strided_slice %3 {offsets = [0, 0], sizes = [1, 1], strides = [1, 1]} : vector<1x2xf32> to vector<1x1xf32>
    %10 = vector.broadcast %9 : vector<1x1xf32> to vector<2x1xf32>
    %11 = arith.addf %8, %10 : vector<2x1xf32>
    %12 = vector.extract_strided_slice %2 {offsets = [1, 0], sizes = [1, 64], strides = [1, 1]} : vector<2x64xf32> to vector<1x64xf32>
    %13 = vector.broadcast %12 : vector<1x64xf32> to vector<2x64xf32>
    %14 = arith.mulf %1, %13 : vector<2x64xf32>
    %cst_5 = arith.constant dense<0.000000e+00> : vector<2xf32>
    %15 = vector.multi_reduction <add>, %14, %cst_5 [1] : vector<2x64xf32> to vector<2xf32>
    %16 = vector.shape_cast %15 : vector<2xf32> to vector<2x1xf32>
    %17 = vector.extract_strided_slice %3 {offsets = [0, 1], sizes = [1, 1], strides = [1, 1]} : vector<1x2xf32> to vector<1x1xf32>
    %18 = vector.broadcast %17 : vector<1x1xf32> to vector<2x1xf32>
    %19 = arith.addf %16, %18 : vector<2x1xf32>
    %20 = arith.maximumf %11, %19 : vector<2x1xf32>
    %21 = arith.subf %11, %20 : vector<2x1xf32>
    %22 = math.exp %21 : vector<2x1xf32>
    %23 = arith.subf %19, %20 : vector<2x1xf32>
    %24 = math.exp %23 : vector<2x1xf32>
    %25 = arith.addf %22, %24 : vector<2x1xf32>
    %26 = math.log %25 : vector<2x1xf32>
    %27 = arith.addf %20, %26 : vector<2x1xf32>
    %28 = tpu.concatenate %11, %19 in 1 : vector<2x1xf32>, vector<2x1xf32> -> vector<2x2xf32>
    %29 = vector.broadcast %27 : vector<2x1xf32> to vector<2x2xf32>
    %30 = arith.subf %28, %29 : vector<2x2xf32>
    %31 = math.exp %30 : vector<2x2xf32>
    %c0_6 = arith.constant 0 : index
    %c0_7 = arith.constant 0 : index
    %32 = vector.load %arg4[%c0_6, %c0_7] : memref<2x2xf32, #tpu.memory_space<vmem>>, vector<2x2xf32>
    tpu.vector_store %arg4[%c0_6, %c0_7], %31 {strides = array<i32>} : memref<2x2xf32, #tpu.memory_space<vmem>>, vector<2x2xf32>,
    %c0_8 = arith.constant 0 : index
    %c0_9 = arith.constant 0 : index
    %33 = vector.load %arg3[%c0_8, %c0_9] : memref<2x1xi32, #tpu.memory_space<vmem>>, vector<2x1xi32>
    %c0_i32 = arith.constant 0 : i32
    %34 = vector.broadcast %c0_i32 : i32 to vector<2x1xi32>
    %35 = arith.cmpi eq, %33, %34 : vector<2x1xi32>
    %36 = arith.select %35, %11, %19 : vector<2x1xi1>, vector<2x1xf32>
    %37 = arith.subf %27, %36 : vector<2x1xf32>
    %cst_10 = arith.constant dense<0.000000e+00> : vector<1xf32>
    %38 = vector.multi_reduction <add>, %37, %cst_10 [0] : vector<2x1xf32> to vector<1xf32>
    %39 = vector.shape_cast %38 : vector<1xf32> to vector<1x1xf32>
    %cst_11 = arith.constant 5.000000e-01 : f32
    %40 = vector.broadcast %cst_11 : f32 to vector<1x1xf32>
    %41 = arith.mulf %39, %40 : vector<1x1xf32>
    %c0_12 = arith.constant 0 : index
    %c0_13 = arith.constant 0 : index
    %42 = vector.load %arg5[%c0_12, %c0_13] : memref<1x1xf32, #tpu.memory_space<vmem>>, vector<1x1xf32>
    tpu.vector_store %arg5[%c0_12, %c0_13], %41 {strides = array<i32>} : memref<1x1xf32, #tpu.memory_space<vmem>>, vector<1x1xf32>,
    return
  }
}

</mosaic_0001>

<bundles_post_ra>
// kernel: tpu_custom_call.1
= control target key start
LH: loop header
LB: loop body
LE: loop exit
PB: predicated region body
PF: predicated region fallthrough
CT: control target
= control target key end

     0   :  { %11 = vsyncpa [#allocation3], 0  ;;  %v25_v0 = vlaneseq  ;;  %s241_s0 = inlined_call_operand.vmem [shape: bf16[2,64], index: 0, kind: input, shape index: {}]   ;;  %s242_s1 = inlined_call_operand.vmem [shape: f32[2,64], index: 1, kind: input, shape index: {}]   ;;  %s243_s2 = inlined_call_operand.vmem [shape: f32[1,2], index: 2, kind: input, shape index: {}]   ;;  %s244_s3 = inlined_call_operand.vmem [shape: s32[2,1], index: 3, kind: input, shape index: {}]   ;;  %s245_s4 = inlined_call_operand.hbm [shape: f32[2,2], index: 4, kind: output, shape index: {0}]   ;;  %s246_s5 = inlined_call_operand.hbm [shape: f32[1,1], index: 5, kind: output, shape index: {1}]  }
   0x1   :  { %v21_v1 = vld [vmem:[%s241_s0] sm:$0x1] }
   0x2   :  { %12 = vsyncpa [#allocation5], 0  ;;  %v26_v2 = vshrl.u32 %v25_v0, 7  ;;  %v23_v3 = vld [vmem:[%s242_s1] sm:$0x3]  ;;  %v22_v4 = vunpack.c.l.bf16 %v21_v1  ;;  %vm30_vm0 = vcmask 517120  }
   0x3   :  { %v128_v13 = vld [vmem:[%s243_s2] ss:$0 sm:$0xff]  ;;  %s188_s23 = smov 127   ;;  %s189_s1 = smov 1   ;;  %v190_v24 = vmov 0   ;;  %vm89_vm2 = vcmask 1024  }
   0x4   :  { %v43_v5 = vsub.s32 1, %v26_v2  ;;  %v27_v6 = vsub.s32 0, %v26_v2  ;;  %134 = vset.pattern.permute.xlu1 %v190_v24  ;;  %135 = vset.pattern.permute.xlu0 %v190_v24  ;;  %v85_v30 = vld [vmem:[%s244_s3] sm:$0x3]  ;;  %s191_s25 = smov [#allocation4]   ;;  %vm98_vm3 = vcmask 0  }
   0x5   :  { %vm86_vm1 = vcmp.eq.s32.totalorder %v85_v30, 0  ;;  %s116_s26 = sshll.u32 %s191_s25, 4  ;;  %s117_s26 = int_to_ptr.vmem [resolvable:$true] %s116_s26 }
   0x6   :  { %v44_v7 = vrot.slane %v23_v3, %v43_v5  ;;  %v28_v8 = vrot.slane %v23_v3, %v27_v6  ;;  %s144_s3 = scalar_lea.vmem %s117_s26, 16  ;;  %s148_s27 = scalar_lea.vmem %s117_s26, 32 }
   0x7   :  { %p145_p0 = scmp.ne.s32.totalorder %s117_s26, %s144_s3  ;;  %p149_p1 = scmp.lt.s32.totalorder %s117_s26, %s117_s26 }
   0x8   :  { %v45_v9 = vmul.f32 %v44_v7, %v22_v4  ;;  %v29_v10 = vmul.f32 %v28_v8, %v22_v4  ;;  %p150_p2 = scmp.lt.s32.totalorder %s148_s27, %s144_s3 }
   0xa   :  { %v46_v11 = vsel %vm30_vm0, %v45_v9, 0.0  ;;  %v31_v12 = vsel %vm30_vm0, %v29_v10, 0.0  ;;  %p151_p3 = por %p150_p2, %p149_p1 }
   0xb   :  { %47 = vadd.xlane.f32.xlu0 %v46_v11 }
   0xc   :  { %p152_p4 = pnand %p151_p3, %p145_p0 }
   0xf   :  { %32 = vadd.xlane.f32.xlu0 %v31_v12 }
  0x94   :  { %v48_v14 = vpop.xlane.xlu0 %47 }
  0x95   :  { %v49_v15 = vadd.f32 %v128_v13, %v48_v14 }
  0x97   :  { %51 = vrot.lane.b32.xlu1 %v49_v15, %s188_s23 }
  0x98   :  { %v33_v16 = vpop.xlane.xlu0 %32 }
  0x99   :  { %v40_v17 = vadd.f32 %v128_v13, %v33_v16 }
 0x109   :  { %v52_v18 = vpop.permute.xlu1 %51 }
 0x10a   :  { %v54_v19 = vmax.f32 %v40_v17, %v52_v18  ;;  %v87_v34 = vsel %vm86_vm1, %v40_v17, %v52_v18 }
 0x10c   :  { %59 = vrot.lane.b32.xlu1 %v54_v19, %s189_s1  ;;  %v55_v25 = vsub.f32 %v40_v17, %v54_v19 }
 0x10e   :  { %v56_v26 = vmul.f32 1.442695, %v55_v25 }
 0x17e   :  { %v60_v20 = vpop.permute.xlu1 %59 }
 0x17f   :  { %v62_v21 = vsub.f32 %v49_v15, %v60_v20 }
 0x181   :  { %v63_v22 = vmul.f32 1.442695, %v62_v21 }
 0x183   :  { %136 = vpow2.f32 %v63_v22 }
 0x184   :  { %138 = vpow2.f32 %v56_v26 }
 0x190   :  { %v137_v23 = vpop.eup %136 }
 0x191   :  { %66 = vrot.lane.b32.xlu0 %v137_v23, %s188_s23  ;;  %v139_v27 = vpop.eup %138 }
 0x203   :  { %v67_v28 = vpop.permute.xlu0 %66 }
 0x204   :  { %v69_v29 = vadd.f32 %v139_v27, %v67_v28 }
 0x206   :  { %140 = vlog2.f32 %v69_v29 }
 0x213   :  { %v141_v31 = vpop.eup %140 }
 0x214   :  { %v71_v32 = vmul.f32 0.6931472, %v141_v31 }
 0x216   :  { %v72_v33 = vadd.f32 %v71_v32, %v54_v19 }
 0x218   :  { %77 = vperm.xlu1 %134, %v72_v33   ;;  %v88_v35 = vsub.f32 %v72_v33, %v87_v34 }
 0x21a   :  { %v90_v36 = vsel %vm89_vm2, %v88_v35, 0.0 }
 0x21b   :  { %v91_v37 = vrot.slane %v90_v36, 4 }
 0x21d   :  { %v92_v38 = vadd.f32 %v91_v37, %v90_v36 }
 0x21f   :  { %v93_v39 = vrot.slane %v92_v38, 2 }
 0x221   :  { %v94_v40 = vadd.f32 %v93_v39, %v92_v38 }
 0x223   :  { %v95_v41 = vrot.slane %v94_v40, 1 }
 0x225   :  { %v96_v42 = vadd.f32 %v95_v41, %v94_v40 }
 0x227   :  { %v97_v43 = vmul.f32 0.5, %v96_v42 }
 0x229   :  { %99 = vst.msk [vmem:[#allocation4] sm:$0x1] %vm98_vm3, %v97_v43 }
 0x22a   :  { %155 = shalt.err (!%p152_p4)
}
 0x22b   :  { %119 = dma.vmem_to_hbm [thread:$0]  %s117_s26, 16, %s246_s5, [#allocation5]   ;;  %vm73_vm4 = vcmask 7168   ;;  %vm83_vm5 = vcmask 9216  }
 0x22c   :  { %v74_v44 = vsel %vm73_vm4, %v40_v17, %v49_v15  ;;  %s192_s30 = smov [#allocation2]  }
 0x22d   :  { %s106_s6 = sshll.u32 %s192_s30, 4  ;;  %s107_s6 = int_to_ptr.vmem [resolvable:$true] %s106_s6 }
 0x22e   :  { %s164_s7 = scalar_lea.vmem %s107_s6, 32  ;;  %p169_p6 = scmp.lt.s32.totalorder %s107_s6, %s107_s6 }
 0x22f   :  { %p165_p5 = scmp.ne.s32.totalorder %s107_s6, %s164_s7  ;;  %p170_p7 = scmp.lt.s32.totalorder %s164_s7, %s164_s7 }
 0x231   :  { %p171_p8 = por %p170_p7, %p169_p6 }
 0x233   :  { %p172_p9 = pnand %p171_p8, %p165_p5 }
 0x293   :  { %v78_v45 = vpop.permute.xlu1 %77 }
 0x294   :  { %v80_v46 = vsub.f32 %v74_v44, %v78_v45 }
 0x296   :  { %v81_v47 = vmul.f32 1.442695, %v80_v46 }
 0x298   :  { %142 = vpow2.f32 %v81_v47 }
 0x2a5   :  { %v143_v48 = vpop.eup %142 }
 0x2a6   :  { %84 = vst.msk [vmem:[#allocation2] sm:$0x3] %vm83_vm5, %v143_v48 }
 0x2a7   :  { %175 = shalt.err (!%p172_p9)
}
 0x2a8   :  { %109 = dma.vmem_to_hbm [thread:$0]  %s107_s6, 32, %s245_s4, [#allocation3]  }
 0x2a9   :  { %184 = dma.done.wait [#allocation3], 32  }
 0x2aa   :  { %185 = vsyncadd [#allocation3], 4294967264 }
 0x2ab   :  { %186 = dma.done.wait [#allocation5], 16  }
 0x2ac   :  { %187 = vsyncadd [#allocation5], 4294967280 }
 0x2ad   :  { %126 = vsyncpa [#allocation3], 1 }
 0x2ae   :  { %127 = vsyncpa [#allocation5], 1 }

</bundles_post_ra>
